<compile_context>
chip_gen: v7x
topology: tpu7x:2x2x1
jax: 0.10.0
libtpu: 0.0.40
codegen_flags: <defaults>
</compile_context>

<pallas_src>
import functools

import jax
import jax.numpy as jnp
from jax import lax
from jax.experimental import pallas as pl
from jax.experimental.pallas import tpu as pltpu


def _round_up(x: int, m: int) -> int:
    return ((x + m - 1) // m) * m


def _make_kernel(num_hops: int, use_mean: bool, apply_w: bool):
    """Builds a kernel whose signature matches the conditionally-built operand
    list: [adj_row?][adj_full?] feat [w?] b  ->  out."""

    def kernel(*refs):
        idx = 0
        adj_row_ref = adj_full_ref = w_ref = None
        if num_hops >= 1:
            adj_row_ref = refs[idx]; idx += 1
        if num_hops > 1:
            adj_full_ref = refs[idx]; idx += 1
        feat_ref = refs[idx]; idx += 1
        if apply_w:
            w_ref = refs[idx]; idx += 1
        b_ref = refs[idx]; idx += 1
        o_ref = refs[idx]

        tn = o_ref.shape[0]            # rows handled by this grid step
        n = feat_ref.shape[0]          # padded number of vertices
        row_start = pl.multiple_of(pl.program_id(0) * tn, tn)

        # 0-hop reachability for this row tile = self only.
        rows = lax.broadcasted_iota(jnp.int32, (tn, n), 0) + row_start
        cols = lax.broadcasted_iota(jnp.int32, (tn, n), 1)
        eye_rows = (rows == cols).astype(jnp.float32)

        if num_hops == 0:
            reach = eye_rows
        else:
            # Hop-1 folded into the init from the row-tiled int8 adjacency
            # block (no full-resident copy, no in-kernel dynamic slice).
            adj_rows = adj_row_ref[...].astype(jnp.float32)
            reach = jnp.minimum(eye_rows + adj_rows, 1.0)
            if num_hops > 1:
                adj_bf = adj_full_ref[...]            # (n, n) bf16, {0,1}
                # R_{t+1} = min(R_t + R_t @ A, 1); bf16 operands are exact for
                # binary matrices, f32 accumulate, vmin re-binarizes.
                for _ in range(num_hops - 1):
                    prop = jnp.dot(reach.astype(jnp.bfloat16), adj_bf,
                                   preferred_element_type=jnp.float32)
                    reach = jnp.minimum(reach + prop, 1.0)

        feat = feat_ref[...]           # pre-scaled (and pre-W'd if xw_first)
        if feat.dtype == jnp.bfloat16:
            # reach is {0,1} -> exact in bf16; bf16 MXU path, f32 accumulate.
            agg = jnp.dot(reach.astype(jnp.bfloat16), feat,
                          preferred_element_type=jnp.float32)
        else:
            agg = jnp.dot(reach, feat, preferred_element_type=jnp.float32)

        if apply_w:
            f = jnp.dot(agg, w_ref[...], preferred_element_type=jnp.float32)
        else:
            f = agg

        if use_mean:
            nhood = jnp.sum(reach, axis=-1, keepdims=True)
            f = f / nhood              # exact divide (parity with PyTorch)

        o_ref[...] = (f + b_ref[...]).astype(o_ref.dtype)

    return kernel


def convolutional_layer_0p(adj, x, w, b, *, symm_norm=None, num_hops: int = 1,
                           reduction_type: str = "sum", row_tile=None,
                           use_bf16_features: bool = False):
    """Pallas implementation of ConvolutionalLayer_0P.forward."""
    assert reduction_type in ("sum", "mean")
    n, c_in = x.shape
    assert adj.shape == (n, n)
    assert w.shape[0] == c_in
    c_out = w.shape[1]
    LANE = 128

    # Per-generation VMEM capacity (v5e/v6e 128 MiB, v7x 64 MiB).
    try:
        vmem_cap = int(pltpu.get_tpu_info().vmem_capacity_bytes)
    except Exception:  # pragma: no cover - conservative fallback
        vmem_cap = 64 << 20

    # ---- hoist grid-invariant feature work out of the grid loop (wrapper) ----
    feat = jnp.asarray(x, jnp.float32)
    if symm_norm is not None:
        feat = feat * jnp.asarray(symm_norm, jnp.float32).reshape(n, 1)
    xw_first = c_out < c_in            # associate so the N^2 contraction runs
    if xw_first:                       # over the narrower channel width
        feat = jnp.dot(feat, jnp.asarray(w, jnp.float32),
                       preferred_element_type=jnp.float32)      # (n, c_out)
    apply_w = not xw_first

    # ---- vertex-dim padding / adaptive row tile ----
    n8 = _round_up(max(n, 8), 8)
    if row_tile is None:
        if n8 <= 1024:
            row_tile = 512
        else:
            # ~3 live (tn, n_pad) f32/bf16 intermediates -> ~12*tn*n_pad bytes;
            # keep them within ~1/4 of the chip's VMEM.
            per_row = 12 * n8
            row_tile = max(128, min(512, ((vmem_cap // 4) // per_row) // 128 * 128))
    tn = n8 if n8 <= row_tile else _round_up(row_tile, 8)
    n_pad = _round_up(n8, tn)
    pad_n = n_pad - n

    # ---- lane-dense channel padding (x128) ----
    c_feat = feat.shape[1]
    c_feat_pad = _round_up(c_feat, LANE)
    c_out_pad = _round_up(c_out, LANE)

    feat_dtype = jnp.bfloat16 if use_bf16_features else jnp.float32
    feat_p = jnp.pad(feat, ((0, pad_n), (0, c_feat_pad - c_feat))).astype(feat_dtype)
    b_p = jnp.pad(jnp.asarray(b, jnp.float32).reshape(1, c_out),
                  ((0, 0), (0, c_out_pad - c_out)))

    operands = []
    adj_i8 = None
    if num_hops >= 1:
        # Row-tiled adjacency as int8 ({0,1} exact): 1 B/elem HBM traffic.
        adj_i8 = jnp.pad(jnp.asarray(adj), ((0, pad_n), (0, pad_n))).astype(jnp.int8)
        operands.append(adj_i8)
    if num_hops > 1:
        # Full-resident bf16 copy only needed as the RHS of the >1-hop matmuls.
        # TODO(synk): for graphs where n_pad^2 bf16 exceeds VMEM, stream this
        # operand over an extra "arbitrary" K grid axis instead of residency.
        operands.append(adj_i8.astype(jnp.bfloat16))
    operands.append(feat_p)
    if apply_w:
        w_p = jnp.pad(jnp.asarray(w, jnp.float32),
                      ((0, c_feat_pad - c_in), (0, c_out_pad - c_out)))
        operands.append(w_p)
    operands.append(b_p)

    def build_specs(single_buffer: bool):
        res = dict(pipeline_mode=pl.Buffered(1)) if single_buffer else {}
        specs = []
        if num_hops >= 1:
            specs.append(pl.BlockSpec((tn, n_pad), lambda i: (i, 0)))
        if num_hops > 1:
            specs.append(pl.BlockSpec((n_pad, n_pad), lambda i: (0, 0), **res))
        specs.append(pl.BlockSpec((n_pad, c_feat_pad), lambda i: (0, 0), **res))
        if apply_w:
            specs.append(pl.BlockSpec((c_feat_pad, c_out_pad), lambda i: (0, 0), **res))
        specs.append(pl.BlockSpec((1, c_out_pad), lambda i: (0, 0), **res))
        return specs

    def build_compiler_params(single_buffer: bool):
        buf = 1 if single_buffer else 2
        est = 2 * tn * n_pad * 1                                  # adj row tile (dbl buf)
        if num_hops > 1:
            est += buf * n_pad * n_pad * 2
        est += buf * n_pad * c_feat_pad * jnp.dtype(feat_dtype).itemsize
        if apply_w:
            est += buf * c_feat_pad * c_out_pad * 4
        est += buf * c_out_pad * 4
        est += 2 * tn * c_out_pad * 4                             # output tile
        est += 12 * tn * n_pad                                    # reach/prop/casts
        est += 2 << 20                                            # headroom
        kwargs = dict(dimension_semantics=("parallel",))
        scoped_default = 16 << 20      # most conservative default (v5e)
        if est > scoped_default:
            kwargs["vmem_limit_bytes"] = int(min(max(est, scoped_default),
                                                 int(0.85 * vmem_cap)))
        return pltpu.CompilerParams(**kwargs)

    # Advisory cost estimate so XLA can schedule the surrounding pad/slice ops.
    flops = 2 * n_pad * n_pad * c_feat_pad
    if apply_w:
        flops += 2 * n_pad * c_feat_pad * c_out_pad
    if num_hops > 1:
        flops += (num_hops - 1) * 2 * n_pad * n_pad * n_pad
    bytes_accessed = (sum(int(op.size) * op.dtype.itemsize for op in operands)
                      + n_pad * c_out_pad * 4)
    cost = pl.CostEstimate(flops=flops, transcendentals=0,
                           bytes_accessed=bytes_accessed)

    kernel = _make_kernel(num_hops, reduction_type == "mean", apply_w)

    def run(single_buffer: bool):
        return pl.pallas_call(
            kernel,
            out_shape=jax.ShapeDtypeStruct((n_pad, c_out_pad), jnp.float32),
            grid=(n_pad // tn,),
            in_specs=build_specs(single_buffer),
            out_specs=pl.BlockSpec((tn, c_out_pad), lambda i: (i, 0)),
            compiler_params=build_compiler_params(single_buffer),
            cost_estimate=cost,
        )(*operands)

    try:
        out = run(True)               # single-buffered resident operands
    except Exception:
        out = run(False)              # fallback: default double-buffering

    return out[:n, :c_out]


def _xavier_uniform(key, shape):
    fan_in, fan_out = shape
    bound = (6.0 / (fan_in + fan_out)) ** 0.5
    return jax.random.uniform(key, shape, jnp.float32, -bound, bound)


if __name__ == "__main__":
    # Small deterministic example: ring graph with chords, 16 nodes,
    # 8 input channels, 32 output channels.
    N, C_IN, C_OUT, NUM_HOPS = 16, 8, 32, 2

    key = jax.random.PRNGKey(0)
    k_x, k_w, k_w2 = jax.random.split(key, 3)

    x = jax.random.normal(k_x, (N, C_IN), dtype=jnp.float32)

    adj = jnp.zeros((N, N), dtype=jnp.float32)
    idx = jnp.arange(N)
    adj = adj.at[idx, (idx + 1) % N].set(1.0)
    adj = adj.at[(idx + 1) % N, idx].set(1.0)
    adj = adj.at[idx, (idx + 4) % N].set(1.0)
    adj = adj.at[(idx + 4) % N, idx].set(1.0)

    # LazyLinear parameters: xavier-uniform weight, zero bias (deterministic).
    w = _xavier_uniform(k_w, (C_IN, C_OUT))
    b = jnp.zeros((C_OUT,), dtype=jnp.float32)

    # Symmetric normalization (ptensors0 with one channel): D^{-1/2}.
    deg = jnp.maximum(adj.sum(axis=1), 1.0)
    symm_norm = 1.0 / jnp.sqrt(deg)

    # Pure-JAX reference of the same forward semantics.
    def ref_forward(adj, x, w, b, num_hops, reduction, symm_norm=None):
        n_ = x.shape[0]
        reach = jnp.eye(n_, dtype=jnp.float32)
        for _ in range(num_hops):
            reach = jnp.minimum(reach + reach @ adj, 1.0)
        xs = x if symm_norm is None else x * symm_norm[:, None]
        f = reach @ xs
        if reduction == "mean":
            f = f / jnp.sum(reach, axis=-1, keepdims=True)
        return f @ w + b

    # Case 1: sum reduction, 2-hop gather, symmetric normalization, f32 path.
    out1 = convolutional_layer_0p(adj, x, w, b, symm_norm=symm_norm,
                                  num_hops=NUM_HOPS, reduction_type="sum")
    jax.block_until_ready(out1)
    ref1 = ref_forward(adj, x, w, b, NUM_HOPS, "sum", symm_norm)
    assert out1.shape == (N, C_OUT)
    # Tolerance allows for TPU default-precision (bf16-pass) f32 matmuls in
    # both the kernel and the XLA reference.
    assert jnp.allclose(out1, ref1, atol=1e-2, rtol=1e-2), "case 1 mismatch"

    # Case 2: mean reduction, 1-hop gather, wide-in / narrow-out channels
    # (exercises the x@W-first association hoisted into the wrapper, the
    # row-tiled-only adjacency path, and the bf16 gather matmul).
    x2 = jax.random.normal(k_x, (N, C_OUT), dtype=jnp.float32)
    w2 = _xavier_uniform(k_w2, (C_OUT, C_IN))
    b2 = jnp.zeros((C_IN,), dtype=jnp.float32)
    out2 = convolutional_layer_0p(adj, x2, w2, b2, num_hops=1,
                                  reduction_type="mean",
                                  use_bf16_features=True)
    jax.block_until_ready(out2)
    ref2 = ref_forward(adj, x2, w2, b2, 1, "mean")
    assert out2.shape == (N, C_IN)
    assert jnp.allclose(out2, ref2, atol=5e-2, rtol=5e-2), "case 2 mismatch"

    print("KERNEL_OK")
</pallas_src>

<mosaic_0001>
module attributes {stable_mosaic.version = 11 : i64} {
  func.func @kernel(%arg0: i32, %arg1: memref<16x16xi8, #tpu.memory_space<vmem>>, %arg2: memref<16x16xbf16, #tpu.memory_space<vmem>>, %arg3: memref<16x128xf32, #tpu.memory_space<vmem>>, %arg4: memref<128x128xf32, #tpu.memory_space<vmem>>, %arg5: memref<1x128xf32, #tpu.memory_space<vmem>>, %arg6: memref<16x128xf32, #tpu.memory_space<vmem>>) attributes {dimension_semantics = [#tpu.dimension_semantics<parallel>], iteration_bounds = array<i64: 1>, scalar_prefetch = 0 : i64, scratch_operands = 0 : i64, tpu.core_type = #tpu.core_type<tc>, window_params = [{transform_indices = @transform_0, window_bounds = array<i64: 16, 16>}, {pipeline_mode = #tpu.pipeline_mode<synchronous>, transform_indices = @transform_1, window_bounds = array<i64: 16, 16>}, {pipeline_mode = #tpu.pipeline_mode<synchronous>, transform_indices = @transform_2, window_bounds = array<i64: 16, 128>}, {pipeline_mode = #tpu.pipeline_mode<synchronous>, transform_indices = @transform_3, window_bounds = array<i64: 128, 128>}, {pipeline_mode = #tpu.pipeline_mode<synchronous>, transform_indices = @transform_4, window_bounds = array<i64: 1, 128>}, {transform_indices = @transform_5, window_bounds = array<i64: 16, 128>}]} {
    %c16_i32 = arith.constant 16 : i32
    %0 = arith.muli %arg0, %c16_i32 : i32
    %1 = tpu.assume_multiple %0, 16 : i32
    %2 = tpu.iota {dimensions = array<i32: 0>} : vector<16x16xi32>
    %3 = vector.broadcast %1 : i32 to vector<16x16xi32>
    %4 = arith.addi %2, %3 : vector<16x16xi32>
    %5 = tpu.iota {dimensions = array<i32: 1>} : vector<16x16xi32>
    %6 = arith.cmpi eq, %4, %5 : vector<16x16xi32>
    %7 = arith.extui %6 : vector<16x16xi1> to vector<16x16xi32>
    %8 = arith.sitofp %7 : vector<16x16xi32> to vector<16x16xf32>
    %c0 = arith.constant 0 : index
    %c0_0 = arith.constant 0 : index
    %9 = vector.load %arg1[%c0, %c0_0] : memref<16x16xi8, #tpu.memory_space<vmem>>, vector<16x16xi8>
    %10 = arith.sitofp %9 : vector<16x16xi8> to vector<16x16xf32>
    %11 = arith.addf %8, %10 : vector<16x16xf32>
    %cst = arith.constant 1.000000e+00 : f32
    %12 = vector.broadcast %cst : f32 to vector<16x16xf32>
    %13 = arith.minimumf %11, %12 : vector<16x16xf32>
    %c0_1 = arith.constant 0 : index
    %c0_2 = arith.constant 0 : index
    %14 = vector.load %arg2[%c0_1, %c0_2] : memref<16x16xbf16, #tpu.memory_space<vmem>>, vector<16x16xbf16>
    %15 = arith.truncf %13 : vector<16x16xf32> to vector<16x16xbf16>
    %cst_3 = arith.constant dense<0.000000e+00> : vector<16x16xf32>
    %16 = tpu.matmul %15, %14, %cst_3 {dimension_numbers = #tpu.dot_dimension_numbers<[1], [0], [0], [1], [0, 0, 1, 1], [], []>} : vector<16x16xbf16>, vector<16x16xbf16>, vector<16x16xf32> -> vector<16x16xf32>
    %17 = arith.addf %13, %16 : vector<16x16xf32>
    %cst_4 = arith.constant 1.000000e+00 : f32
    %18 = vector.broadcast %cst_4 : f32 to vector<16x16xf32>
    %19 = arith.minimumf %17, %18 : vector<16x16xf32>
    %c0_5 = arith.constant 0 : index
    %c0_6 = arith.constant 0 : index
    %20 = vector.load %arg3[%c0_5, %c0_6] : memref<16x128xf32, #tpu.memory_space<vmem>>, vector<16x128xf32>
    %cst_7 = arith.constant dense<0.000000e+00> : vector<16x128xf32>
    %21 = tpu.matmul %19, %20, %cst_7 {dimension_numbers = #tpu.dot_dimension_numbers<[1], [0], [0], [1], [0, 0, 1, 1], [], []>} : vector<16x16xf32>, vector<16x128xf32>, vector<16x128xf32> -> vector<16x128xf32>
    %c0_8 = arith.constant 0 : index
    %c0_9 = arith.constant 0 : index
    %22 = vector.load %arg4[%c0_8, %c0_9] : memref<128x128xf32, #tpu.memory_space<vmem>>, vector<128x128xf32>
    %cst_10 = arith.constant dense<0.000000e+00> : vector<16x128xf32>
    %23 = tpu.matmul %21, %22, %cst_10 {dimension_numbers = #tpu.dot_dimension_numbers<[1], [0], [0], [1], [0, 0, 1, 1], [], []>} : vector<16x128xf32>, vector<128x128xf32>, vector<16x128xf32> -> vector<16x128xf32>
    %c0_11 = arith.constant 0 : index
    %c0_12 = arith.constant 0 : index
    %24 = vector.load %arg5[%c0_11, %c0_12] : memref<1x128xf32, #tpu.memory_space<vmem>>, vector<1x128xf32>
    %25 = vector.broadcast %24 : vector<1x128xf32> to vector<16x128xf32>
    %26 = arith.addf %23, %25 : vector<16x128xf32>
    %c0_13 = arith.constant 0 : index
    %c0_14 = arith.constant 0 : index
    %27 = vector.load %arg6[%c0_13, %c0_14] : memref<16x128xf32, #tpu.memory_space<vmem>>, vector<16x128xf32>
    tpu.vector_store %arg6[%c0_13, %c0_14], %26 {strides = array<i32>} : memref<16x128xf32, #tpu.memory_space<vmem>>, vector<16x128xf32>,
    return
  }
  func.func @transform_0(%arg0: i32) -> (i32, i32) {
    %c0_i32 = arith.constant 0 : i32
    %c0_i32_0 = arith.constant 0 : i32
    return %arg0, %c0_i32 : i32, i32
  }
  func.func @transform_1(%arg0: i32) -> (i32, i32) {
    %c0_i32 = arith.constant 0 : i32
    %c0_i32_0 = arith.constant 0 : i32
    %c0_i32_1 = arith.constant 0 : i32
    return %c0_i32, %c0_i32_0 : i32, i32
  }
  func.func @transform_2(%arg0: i32) -> (i32, i32) {
    %c0_i32 = arith.constant 0 : i32
    %c0_i32_0 = arith.constant 0 : i32
    %c0_i32_1 = arith.constant 0 : i32
    return %c0_i32, %c0_i32_0 : i32, i32
  }
  func.func @transform_3(%arg0: i32) -> (i32, i32) {
    %c0_i32 = arith.constant 0 : i32
    %c0_i32_0 = arith.constant 0 : i32
    %c0_i32_1 = arith.constant 0 : i32
    return %c0_i32, %c0_i32_0 : i32, i32
  }
  func.func @transform_4(%arg0: i32) -> (i32, i32) {
    %c0_i32 = arith.constant 0 : i32
    %c0_i32_0 = arith.constant 0 : i32
    %c0_i32_1 = arith.constant 0 : i32
    return %c0_i32, %c0_i32_0 : i32, i32
  }
  func.func @transform_5(%arg0: i32) -> (i32, i32) {
    %c0_i32 = arith.constant 0 : i32
    %c0_i32_0 = arith.constant 0 : i32
    return %arg0, %c0_i32 : i32, i32
  }
}

module attributes {stable_mosaic.version = 11 : i64} {
  func.func @kernel(%arg0: i32, %arg1: memref<16x16xi8, #tpu.memory_space<vmem>>, %arg2: memref<16x16xbf16, #tpu.memory_space<vmem>>, %arg3: memref<16x128xf32, #tpu.memory_space<vmem>>, %arg4: memref<128x128xf32, #tpu.memory_space<vmem>>, %arg5: memref<1x128xf32, #tpu.memory_space<vmem>>, %arg6: memref<16x128xf32, #tpu.memory_space<vmem>>) attributes {dimension_semantics = [#tpu.dimension_semantics<parallel>], iteration_bounds = array<i64: 1>, scalar_prefetch = 0 : i64, scratch_operands = 0 : i64, tpu.core_type = #tpu.core_type<tc>, window_params = [{transform_indices = @transform_0, window_bounds = array<i64: 16, 16>}, {pipeline_mode = #tpu.pipeline_mode<synchronous>, transform_indices = @transform_1, window_bounds = array<i64: 16, 16>}, {pipeline_mode = #tpu.pipeline_mode<synchronous>, transform_indices = @transform_2, window_bounds = array<i64: 16, 128>}, {pipeline_mode = #tpu.pipeline_mode<synchronous>, transform_indices = @transform_3, window_bounds = array<i64: 128, 128>}, {pipeline_mode = #tpu.pipeline_mode<synchronous>, transform_indices = @transform_4, window_bounds = array<i64: 1, 128>}, {transform_indices = @transform_5, window_bounds = array<i64: 16, 128>}]} {
    %c16_i32 = arith.constant 16 : i32
    %0 = arith.muli %arg0, %c16_i32 : i32
    %1 = tpu.assume_multiple %0, 16 : i32
    %2 = tpu.iota {dimensions = array<i32: 0>} : vector<16x16xi32>
    %3 = vector.broadcast %1 : i32 to vector<16x16xi32>
    %4 = arith.addi %2, %3 : vector<16x16xi32>
    %5 = tpu.iota {dimensions = array<i32: 1>} : vector<16x16xi32>
    %6 = arith.cmpi eq, %4, %5 : vector<16x16xi32>
    %7 = arith.extui %6 : vector<16x16xi1> to vector<16x16xi32>
    %8 = arith.sitofp %7 : vector<16x16xi32> to vector<16x16xf32>
    %c0 = arith.constant 0 : index
    %c0_0 = arith.constant 0 : index
    %9 = vector.load %arg1[%c0, %c0_0] : memref<16x16xi8, #tpu.memory_space<vmem>>, vector<16x16xi8>
    %10 = arith.sitofp %9 : vector<16x16xi8> to vector<16x16xf32>
    %11 = arith.addf %8, %10 : vector<16x16xf32>
    %cst = arith.constant 1.000000e+00 : f32
    %12 = vector.broadcast %cst : f32 to vector<16x16xf32>
    %13 = arith.minimumf %11, %12 : vector<16x16xf32>
    %c0_1 = arith.constant 0 : index
    %c0_2 = arith.constant 0 : index
    %14 = vector.load %arg2[%c0_1, %c0_2] : memref<16x16xbf16, #tpu.memory_space<vmem>>, vector<16x16xbf16>
    %15 = arith.truncf %13 : vector<16x16xf32> to vector<16x16xbf16>
    %cst_3 = arith.constant dense<0.000000e+00> : vector<16x16xf32>
    %16 = tpu.matmul %15, %14, %cst_3 {dimension_numbers = #tpu.dot_dimension_numbers<[1], [0], [0], [1], [0, 0, 1, 1], [], []>} : vector<16x16xbf16>, vector<16x16xbf16>, vector<16x16xf32> -> vector<16x16xf32>
    %17 = arith.addf %13, %16 : vector<16x16xf32>
    %cst_4 = arith.constant 1.000000e+00 : f32
    %18 = vector.broadcast %cst_4 : f32 to vector<16x16xf32>
    %19 = arith.minimumf %17, %18 : vector<16x16xf32>
    %c0_5 = arith.constant 0 : index
    %c0_6 = arith.constant 0 : index
    %20 = vector.load %arg3[%c0_5, %c0_6] : memref<16x128xf32, #tpu.memory_space<vmem>>, vector<16x128xf32>
    %cst_7 = arith.constant dense<0.000000e+00> : vector<16x128xf32>
    %21 = tpu.matmul %19, %20, %cst_7 {dimension_numbers = #tpu.dot_dimension_numbers<[1], [0], [0], [1], [0, 0, 1, 1], [], []>} : vector<16x16xf32>, vector<16x128xf32>, vector<16x128xf32> -> vector<16x128xf32>
    %c0_8 = arith.constant 0 : index
    %c0_9 = arith.constant 0 : index
    %22 = vector.load %arg4[%c0_8, %c0_9] : memref<128x128xf32, #tpu.memory_space<vmem>>, vector<128x128xf32>
    %cst_10 = arith.constant dense<0.000000e+00> : vector<16x128xf32>
    %23 = tpu.matmul %21, %22, %cst_10 {dimension_numbers = #tpu.dot_dimension_numbers<[1], [0], [0], [1], [0, 0, 1, 1], [], []>} : vector<16x128xf32>, vector<128x128xf32>, vector<16x128xf32> -> vector<16x128xf32>
    %c0_11 = arith.constant 0 : index
    %c0_12 = arith.constant 0 : index
    %24 = vector.load %arg5[%c0_11, %c0_12] : memref<1x128xf32, #tpu.memory_space<vmem>>, vector<1x128xf32>
    %25 = vector.broadcast %24 : vector<1x128xf32> to vector<16x128xf32>
    %26 = arith.addf %23, %25 : vector<16x128xf32>
    %c0_13 = arith.constant 0 : index
    %c0_14 = arith.constant 0 : index
    %27 = vector.load %arg6[%c0_13, %c0_14] : memref<16x128xf32, #tpu.memory_space<vmem>>, vector<16x128xf32>
    tpu.vector_store %arg6[%c0_13, %c0_14], %26 {strides = array<i32>} : memref<16x128xf32, #tpu.memory_space<vmem>>, vector<16x128xf32>,
    return
  }
  func.func @transform_0(%arg0: i32) -> (i32, i32) {
    %c0_i32 = arith.constant 0 : i32
    %c0_i32_0 = arith.constant 0 : i32
    return %arg0, %c0_i32 : i32, i32
  }
  func.func @transform_1(%arg0: i32) -> (i32, i32) {
    %c0_i32 = arith.constant 0 : i32
    %c0_i32_0 = arith.constant 0 : i32
    %c0_i32_1 = arith.constant 0 : i32
    return %c0_i32, %c0_i32_0 : i32, i32
  }
  func.func @transform_2(%arg0: i32) -> (i32, i32) {
    %c0_i32 = arith.constant 0 : i32
    %c0_i32_0 = arith.constant 0 : i32
    %c0_i32_1 = arith.constant 0 : i32
    return %c0_i32, %c0_i32_0 : i32, i32
  }
  func.func @transform_3(%arg0: i32) -> (i32, i32) {
    %c0_i32 = arith.constant 0 : i32
    %c0_i32_0 = arith.constant 0 : i32
    %c0_i32_1 = arith.constant 0 : i32
    return %c0_i32, %c0_i32_0 : i32, i32
  }
  func.func @transform_4(%arg0: i32) -> (i32, i32) {
    %c0_i32 = arith.constant 0 : i32
    %c0_i32_0 = arith.constant 0 : i32
    %c0_i32_1 = arith.constant 0 : i32
    return %c0_i32, %c0_i32_0 : i32, i32
  }
  func.func @transform_5(%arg0: i32) -> (i32, i32) {
    %c0_i32 = arith.constant 0 : i32
    %c0_i32_0 = arith.constant 0 : i32
    return %arg0, %c0_i32 : i32, i32
  }
}

</mosaic_0001>

<bundles_post_ra>
// kernel: tpu_custom_call.1
= control target key start
LH: loop header
LB: loop body
LE: loop exit
PB: predicated region body
PF: predicated region fallthrough
CT: control target
= control target key end

     0   :  { %10 = vsyncpa [#allocation3], 0  ;;  %s731_s0 = inlined_call_operand.hbm [shape: s8[16,16], index: 0, kind: input, shape index: {}]   ;;  %s732_s1 = inlined_call_operand.hbm [shape: bf16[16,16], index: 1, kind: input, shape index: {}]   ;;  %s733_s2 = inlined_call_operand.hbm [shape: f32[16,128], index: 2, kind: input, shape index: {}]   ;;  %s734_s3 = inlined_call_operand.hbm [shape: f32[128,128], index: 3, kind: input, shape index: {}]   ;;  %s735_s4 = inlined_call_operand.vmem [shape: f32[1,128], index: 4, kind: input, shape index: {}]   ;;  %s736_s5 = inlined_call_operand.hbm [shape: f32[16,128], index: 5, kind: output, shape index: {}]  }
   0x1   :  { %11 = vsyncpa [#allocation6], 0 }
   0x2   :  { %12 = vsyncpa [#allocation9], 0 }
   0x3   :  { %13 = vsyncpa [#allocation4], 0  ;;  %s613_s18 = smov [#allocation5]   ;;  %s495_s22 = scalar_lea.hbm %s732_s1, 128 }
   0x4   :  { %s31_s19 = sshll.u32 %s613_s18, 4  ;;  %p496_p0 = scmp.ne.s32.totalorder %s732_s1, %s495_s22  ;;  %s32_s19 = int_to_ptr.vmem [resolvable:$true] %s31_s19 }
   0x5   :  { %p499_p1 = scmp.lt.u32.totalorder %s495_s22, %s732_s1 }
   0x7   :  { %p501_p2 = pnand %p499_p1, %p496_p0 }
   0x9   :  { %504 = shalt.err (!%p501_p2)
}
   0xa   :  { %s505_s27 = scalar_lea.vmem %s32_s19, 128  ;;  %p510_p4 = scmp.lt.s32.totalorder %s32_s19, %s32_s19 }
   0xb   :  { %p506_p3 = scmp.ne.s32.totalorder %s32_s19, %s505_s27  ;;  %p511_p5 = scmp.lt.s32.totalorder %s505_s27, %s505_s27 }
   0xd   :  { %p512_p6 = por %p511_p5, %p510_p4 }
   0xf   :  { %p513_p7 = pnand %p512_p6, %p506_p3 }
  0x11   :  { %516 = shalt.err (!%p513_p7)
}
  0x12   :  { %s614_s28 = smov 64   ;;  %s615_s29 = smov 4  }
  0x13   :  { %37 = dma.hbm_to_vmem [thread:$0]  %s732_s1, 128, %s32_s19, [#allocation6], %s614_s28, %s614_s28, %s615_s29  }
  0x14   :  { %s616_s7 = smov [#allocation2]   ;;  %s517_s11 = scalar_lea.hbm %s731_s0, 64 }
  0x15   :  { %s19_s8 = sshll.u32 %s616_s7, 4  ;;  %p518_p8 = scmp.ne.s32.totalorder %s731_s0, %s517_s11  ;;  %s20_s8 = int_to_ptr.vmem [resolvable:$true] %s19_s8 }
  0x16   :  { %p521_p9 = scmp.lt.u32.totalorder %s517_s11, %s731_s0 }
  0x18   :  { %p523_p10 = pnand %p521_p9, %p518_p8 }
  0x1a   :  { %526 = shalt.err (!%p523_p10)
}
  0x1b   :  { %s527_s16 = scalar_lea.vmem %s20_s8, 64  ;;  %p532_p12 = scmp.lt.s32.totalorder %s20_s8, %s20_s8 }
  0x1c   :  { %p528_p11 = scmp.ne.s32.totalorder %s20_s8, %s527_s16  ;;  %p533_p13 = scmp.lt.s32.totalorder %s527_s16, %s527_s16 }
  0x1e   :  { %p534_p0 = por %p533_p13, %p532_p12 }
  0x20   :  { %p535_p1 = pnand %p534_p0, %p528_p11 }
  0x22   :  { %538 = shalt.err (!%p535_p1)
}
  0x23   :  { %s617_s1 = smov 32   ;;  %s618_s17 = smov 2  }
  0x24   :  { %25 = dma.hbm_to_vmem [thread:$0]  %s731_s0, 64, %s20_s8, [#allocation3], %s617_s1, %s617_s1, %s618_s17  }
  0x25   :  { %s619_s20 = smov [#allocation7]   ;;  %s539_s24 = scalar_lea.hbm %s733_s2, 256 }
  0x26   :  { %s43_s21 = sshll.u32 %s619_s20, 4  ;;  %p540_p2 = scmp.ne.s32.totalorder %s733_s2, %s539_s24  ;;  %s44_s21 = int_to_ptr.vmem [resolvable:$true] %s43_s21 }
  0x27   :  { %p543_p3 = scmp.lt.u32.totalorder %s539_s24, %s733_s2 }
  0x29   :  { %p545_p4 = pnand %p543_p3, %p540_p2 }
  0x2b   :  { %548 = shalt.err (!%p545_p4)
}
  0x2c   :  { %s549_s29 = scalar_lea.vmem %s44_s21, 256  ;;  %p554_p6 = scmp.lt.s32.totalorder %s44_s21, %s44_s21 }
  0x2d   :  { %p550_p5 = scmp.ne.s32.totalorder %s44_s21, %s549_s29  ;;  %p555_p7 = scmp.lt.s32.totalorder %s549_s29, %s549_s29 }
  0x2f   :  { %p556_p8 = por %p555_p7, %p554_p6 }
  0x31   :  { %p557_p9 = pnand %p556_p8, %p550_p5 }
  0x33   :  { %560 = shalt.err (!%p557_p9)
}
  0x34   :  { %s620_s0 = smov 128   ;;  %s621_s30 = smov 8  }
  0x35   :  { %49 = dma.hbm_to_vmem [thread:$0]  %s733_s2, 256, %s44_s21, [#allocation6], %s620_s0, %s620_s0, %s621_s30  }
  0x36   :  { %s622_s8 = smov [#allocation8]   ;;  %s561_s12 = scalar_lea.hbm %s734_s3, 2048 }
  0x37   :  { %s55_s9 = sshll.u32 %s622_s8, 4  ;;  %p562_p10 = scmp.ne.s32.totalorder %s734_s3, %s561_s12  ;;  %s56_s9 = int_to_ptr.vmem [resolvable:$true] %s55_s9 }
  0x38   :  { %p565_p11 = scmp.lt.u32.totalorder %s561_s12, %s734_s3 }
  0x3a   :  { %p567_p12 = pnand %p565_p11, %p562_p10 }
  0x3c   :  { %570 = shalt.err (!%p567_p12)
}
  0x3d   :  { %s571_s1 = scalar_lea.vmem %s56_s9, 2048  ;;  %p576_p0 = scmp.lt.s32.totalorder %s56_s9, %s56_s9 }
  0x3e   :  { %p572_p13 = scmp.ne.s32.totalorder %s56_s9, %s571_s1  ;;  %p577_p1 = scmp.lt.s32.totalorder %s571_s1, %s571_s1 }
  0x40   :  { %p578_p2 = por %p577_p1, %p576_p0 }
  0x42   :  { %p579_p3 = pnand %p578_p2, %p572_p13 }
  0x44   :  { %582 = shalt.err (!%p579_p3)
}
  0x45   :  { %61 = dma.hbm_to_vmem [thread:$0]  %s734_s3, 2048, %s56_s9, [#allocation9], %s620_s0, %s620_s0, %s621_s30  }
  0x46   :  { %605 = dma.done.wait [#allocation3], 64  }
  0x47   :  { %606 = vsyncadd [#allocation3], 4294967232 }
  0x48   :  { %607 = dma.done.wait [#allocation6], 384  }
  0x49   :  { %608 = vsyncadd [#allocation6], 4294966912 }
  0x4a   :  { %609 = dma.done.wait [#allocation9], 2048  }
  0x4b   :  { %610 = vsyncadd [#allocation9], 4294965248  ;;  %v78_v0 = vlaneseq  ;;  %v623_v1 = vmov 0.0   ;;  %vm624_vm0 = vmmov 0   ;;  %v370_v5 = vld [vmem:[#allocation2] sm:$0xf]  }
  0x4c   :  { %397 = vmatprep.subr.bf16.mxu1 %v623_v1  ;;  %399 = vmatprep.mubr.msk.bf16.mxu1 %vm624_vm0, %v623_v1  ;;  %v494_v6 = vld [vmem:[#allocation5] sm:$0xff]   ;;  %v371_v7 = vunpack.c.0.s8 %v370_v5  ;;  %v372_v8 = vunpack.c.1.s8 %v370_v5  ;;  %v160_v9 = vld [vmem:[#allocation7] sm:$0xff]  ;;  %v161_v10 = vld [vmem:[#allocation7 + $0x8] sm:$0xff]  ;;  %vm111_vm3 = vcmask 130048   ;;  %s625_s19 = smov [#allocation10]  }
  0x4d   :  { %v79_v2 = vshrl.u32 %v78_v0, 7  ;;  %v85_v3 = vand.u32 127, %v78_v0  ;;  %398 = vmatpush3.bf16.msra.mxu1 %v494_v6  ;;  %v445_v13 = vpack.c.bf16 %v161_v10, %v160_v9  ;;  %v243_v21 = vld [vmem:[#allocation8] sm:$0xff]  ;;  %v244_v22 = vld [vmem:[#allocation8 + $0x8] sm:$0xff]  ;;  %v245_v23 = vld [vmem:[#allocation8 + $0x10] sm:$0xff]  ;;  %s348_s20 = sshll.u32 %s625_s19, 4  ;;  %s349_s20 = int_to_ptr.vmem [resolvable:$true] %s348_s20 }
  0x4e   :  { %v96_v14 = vcvt.s32.f32 %v371_v7  ;;  %v97_v15 = vcvt.s32.f32 %v372_v8  ;;  %v449_v24 = vpack.c.bf16 %v244_v22, %v243_v21  ;;  %v246_v25 = vld [vmem:[#allocation8 + $0x18] sm:$0xff]  ;;  %v247_v27 = vld [vmem:[#allocation8 + $0x20] sm:$0xff]  ;;  %v248_v28 = vld [vmem:[#allocation8 + $0x28] sm:$0xff]  ;;  %s583_s21 = scalar_lea.vmem %s349_s20, 256  ;;  %p588_p5 = scmp.lt.s32.totalorder %s349_s20, %s349_s20 }
  0x4f   :  { %v80_v4 = vadd.s32 8, %v79_v2  ;;  %vm86_vm1 = vcmp.eq.s32.totalorder %v79_v2, %v85_v3  ;;  %446 = vmatprep.subr.bf16.mxu1 %v445_v13  ;;  %v453_v26 = vpack.c.bf16 %v246_v25, %v245_v23  ;;  %v457_v29 = vpack.c.bf16 %v248_v28, %v247_v27  ;;  %v249_v30 = vld [vmem:[#allocation8 + $0x30] sm:$0xff]  ;;  %v250_v31 = vld [vmem:[#allocation8 + $0x38] sm:$0xff]  ;;  %v251_v33 = vld [vmem:[#allocation8 + $0x40] sm:$0xff]  ;;  %p584_p4 = scmp.ne.s32.totalorder %s349_s20, %s583_s21  ;;  %p589_p6 = scmp.lt.s32.totalorder %s583_s21, %s583_s21 }
  0x50   :  { %v362_v11 = vsel %vm86_vm1, 1.0, %v623_v1  ;;  %450 = vmatprep.subr.bf16.mxu0 %v449_v24  ;;  %v461_v32 = vpack.c.bf16 %v250_v31, %v249_v30  ;;  %v252_v34 = vld [vmem:[#allocation8 + $0x48] sm:$0xff]  ;;  %v253_v36 = vld [vmem:[#allocation8 + $0x50] sm:$0xff]  ;;  %v254_v37 = vld [vmem:[#allocation8 + $0x58] sm:$0xff] }
  0x51   :  { %vm87_vm2 = vcmp.eq.s32.totalorder %v80_v4, %v85_v3  ;;  %v98_v16 = vadd.f32 %v362_v11, %v96_v14  ;;  %452 = vmatpush3.bf16.msra.mxu0 %v449_v24  ;;  %v465_v35 = vpack.c.bf16 %v252_v34, %v251_v33  ;;  %v469_v38 = vpack.c.bf16 %v254_v37, %v253_v36  ;;  %v255_v39 = vld [vmem:[#allocation8 + $0x60] sm:$0xff]  ;;  %v256_v40 = vld [vmem:[#allocation8 + $0x68] sm:$0xff]  ;;  %v257_v42 = vld [vmem:[#allocation8 + $0x70] sm:$0xff]  ;;  %p590_p7 = por %p589_p6, %p588_p5 }
  0x52   :  { %v363_v12 = vsel %vm87_vm2, 1.0, %v623_v1  ;;  %454 = vmatprep.subr.bf16.mxu0 %v453_v26  ;;  %v473_v41 = vpack.c.bf16 %v256_v40, %v255_v39  ;;  %v258_v43 = vld [vmem:[#allocation8 + $0x78] sm:$0xff]  ;;  %v368_v55 = vld [vmem:[%s735_s4] ss:$0 sm:$0xff] }
  0x53   :  { %v99_v17 = vadd.f32 %v363_v12, %v97_v15  ;;  %v100_v18 = vmin.f32 %v98_v16, 1.0  ;;  %v477_v44 = vpack.c.bf16 %v258_v43, %v257_v42  ;;  %p591_p8 = pnand %p590_p7, %p584_p4 }
  0x55   :  { %v101_v19 = vmin.f32 %v99_v17, 1.0  ;;  %456 = vmatpush3.bf16.msra.mxu0 %v453_v26 }
  0x56   :  { %458 = vmatprep.subr.bf16.mxu0 %v457_v29 }
  0x57   :  { %v104_v20 = vpack.c.bf16 %v101_v19, %v100_v18 }
  0x59   :  { %400 = vmatmul.mubr.msk.bf16.vlgmr.msra.gmra.mrb[0].mxu1 %vm111_vm3, %v104_v20  ;;  %460 = vmatpush3.bf16.msra.mxu0 %v457_v29 }
  0x5a   :  { %448 = vmatpush3.bf16.msra.mxu1 %v445_v13  ;;  %462 = vmatprep.subr.bf16.mxu0 %v461_v32 }
  0x5d   :  { %464 = vmatpush3.bf16.msra.mxu0 %v461_v32 }
  0x5e   :  { %466 = vmatprep.subr.bf16.mxu0 %v465_v35 }
  0x61   :  { %468 = vmatpush3.bf16.msra.mxu0 %v465_v35 }
  0x62   :  { %470 = vmatprep.subr.bf16.mxu0 %v469_v38 }
  0x65   :  { %472 = vmatpush3.bf16.msra.mxu0 %v469_v38 }
  0x66   :  { %474 = vmatprep.subr.bf16.mxu0 %v473_v41 }
  0x69   :  { %476 = vmatpush3.bf16.msra.mxu0 %v473_v41 }
  0x6a   :  { %478 = vmatprep.subr.bf16.mxu0 %v477_v44 }
  0x6d   :  { %480 = vmatpush3.bf16.msra.mxu0 %v477_v44 }
 0x12c   :  { %v149_v45 = vpop.f32.mrb[0].mxu1 }
 0x12d   :  { %v156_v46 = vadd.f32 %v149_v45, %v100_v18  ;;  %v401_v47 = vpop.f32.mrb[1].mxu1 }
 0x12e   :  { %v152_v48 = vpop.f32.mrb[2].mxu1 }
 0x12f   :  { %v158_v49 = vmin.f32 %v156_v46, 1.0  ;;  %v157_v50 = vadd.f32 %v152_v48, %v101_v19  ;;  %v402_v51 = vpop.f32.mrb[3].mxu1 }
 0x131   :  { %v159_v52 = vmin.f32 %v157_v50, 1.0  ;;  %407 = vmatprep.mubr.msk.f32.mxu1 %vm111_vm3, %v158_v49 }
 0x133   :  { %408 = vmatmul.mubr.msk.f32.vlgmr.msra.gmra.mrb[4].mxu1 %vm111_vm3, %v159_v52 }
 0x206   :  { %v409_v53 = vpop.f32.mrb[4].mxu1 }
 0x207   :  { %v234_v54 = vpop.f32.mrb[5].mxu1 }
 0x208   :  { %442 = vmatprep.mubr.f32.mxu0 %v234_v54 }
 0x209   :  { %443 = vmatmul.mubr.f32.vlgmr.msra.gmra.mrb[0].mxu0 %v409_v53 }
 0x2dc   :  { %v444_v56 = vpop.f32.mrb[0].mxu0 }
 0x2dd   :  { %v338_v57 = vadd.f32 %v444_v56, %v368_v55  ;;  %v332_v58 = vpop.f32.mrb[1].mxu0 }
 0x2de   :  { %v333_v59 = vadd.f32 %v368_v55, %v332_v58 }
 0x2df   :  { %342 = vst [vmem:[#allocation10 + $0x8] sm:$0xff] %v338_v57 }
 0x2e0   :  { %341 = vst [vmem:[#allocation10] sm:$0xff] %v333_v59 }
 0x2e1   :  { %594 = shalt.err (!%p591_p8)
}
 0x2e2   :  { %s595_s4 = scalar_lea.hbm %s736_s5, 256 }
 0x2e3   :  { %p596_p9 = scmp.ne.s32.totalorder %s736_s5, %s595_s4  ;;  %p599_p10 = scmp.lt.u32.totalorder %s595_s4, %s736_s5 }
 0x2e5   :  { %p601_p11 = pnand %p599_p10, %p596_p9 }
 0x2e7   :  { %604 = shalt.err (!%p601_p11)
}
 0x2e8   :  { %354 = dma.vmem_to_hbm [thread:$0]  %s349_s20, 256, %s736_s5, [#allocation4], %s620_s0, %s620_s0, %s621_s30  }
 0x2e9   :  { %611 = dma.done.wait [#allocation4], 256  }
 0x2ea   :  { %612 = vsyncadd [#allocation4], 4294967040 }
 0x2eb   :  { %358 = vsyncpa [#allocation3], 1 }
 0x2ec   :  { %359 = vsyncpa [#allocation6], 1 }
 0x2ed   :  { %360 = vsyncpa [#allocation9], 1 }
 0x2ee   :  { %361 = vsyncpa [#allocation4], 1 }

// kernel: tpu_custom_call.1
= control target key start
LH: loop header
LB: loop body
LE: loop exit
PB: predicated region body
PF: predicated region fallthrough
CT: control target
= control target key end

     0   :  { %10 = vsyncpa [#allocation3], 0  ;;  %s731_s0 = inlined_call_operand.hbm [shape: s8[16,16], index: 0, kind: input, shape index: {}]   ;;  %s732_s1 = inlined_call_operand.hbm [shape: bf16[16,16], index: 1, kind: input, shape index: {}]   ;;  %s733_s2 = inlined_call_operand.hbm [shape: f32[16,128], index: 2, kind: input, shape index: {}]   ;;  %s734_s3 = inlined_call_operand.hbm [shape: f32[128,128], index: 3, kind: input, shape index: {}]   ;;  %s735_s4 = inlined_call_operand.vmem [shape: f32[1,128], index: 4, kind: input, shape index: {}]   ;;  %s736_s5 = inlined_call_operand.hbm [shape: f32[16,128], index: 5, kind: output, shape index: {}]  }
   0x1   :  { %11 = vsyncpa [#allocation6], 0 }
   0x2   :  { %12 = vsyncpa [#allocation9], 0 }
   0x3   :  { %13 = vsyncpa [#allocation4], 0  ;;  %s613_s18 = smov [#allocation5]   ;;  %s495_s22 = scalar_lea.hbm %s732_s1, 128 }
   0x4   :  { %s31_s19 = sshll.u32 %s613_s18, 4  ;;  %p496_p0 = scmp.ne.s32.totalorder %s732_s1, %s495_s22  ;;  %s32_s19 = int_to_ptr.vmem [resolvable:$true] %s31_s19 }
   0x5   :  { %p499_p1 = scmp.lt.u32.totalorder %s495_s22, %s732_s1 }
   0x7   :  { %p501_p2 = pnand %p499_p1, %p496_p0 }
   0x9   :  { %504 = shalt.err (!%p501_p2)
}
   0xa   :  { %s505_s27 = scalar_lea.vmem %s32_s19, 128  ;;  %p510_p4 = scmp.lt.s32.totalorder %s32_s19, %s32_s19 }
   0xb   :  { %p506_p3 = scmp.ne.s32.totalorder %s32_s19, %s505_s27  ;;  %p511_p5 = scmp.lt.s32.totalorder %s505_s27, %s505_s27 }
   0xd   :  { %p512_p6 = por %p511_p5, %p510_p4 }
   0xf   :  { %p513_p7 = pnand %p512_p6, %p506_p3 }
  0x11   :  { %516 = shalt.err (!%p513_p7)
}
  0x12   :  { %s614_s28 = smov 64   ;;  %s615_s29 = smov 4  }
  0x13   :  { %37 = dma.hbm_to_vmem [thread:$0]  %s732_s1, 128, %s32_s19, [#allocation6], %s614_s28, %s614_s28, %s615_s29  }
  0x14   :  { %s616_s7 = smov [#allocation2]   ;;  %s517_s11 = scalar_lea.hbm %s731_s0, 64 }
  0x15   :  { %s19_s8 = sshll.u32 %s616_s7, 4  ;;  %p518_p8 = scmp.ne.s32.totalorder %s731_s0, %s517_s11  ;;  %s20_s8 = int_to_ptr.vmem [resolvable:$true] %s19_s8 }
  0x16   :  { %p521_p9 = scmp.lt.u32.totalorder %s517_s11, %s731_s0 }
  0x18   :  { %p523_p10 = pnand %p521_p9, %p518_p8 }
  0x1a   :  { %526 = shalt.err (!%p523_p10)
}
  0x1b   :  { %s527_s16 = scalar_lea.vmem %s20_s8, 64  ;;  %p532_p12 = scmp.lt.s32.totalorder %s20_s8, %s20_s8 }
  0x1c   :  { %p528_p11 = scmp.ne.s32.totalorder %s20_s8, %s527_s16  ;;  %p533_p13 = scmp.lt.s32.totalorder %s527_s16, %s527_s16 }
  0x1e   :  { %p534_p0 = por %p533_p13, %p532_p12 }
  0x20   :  { %p535_p1 = pnand %p534_p0, %p528_p11 }
  0x22   :  { %538 = shalt.err (!%p535_p1)
}
  0x23   :  { %s617_s1 = smov 32   ;;  %s618_s17 = smov 2  }
  0x24   :  { %25 = dma.hbm_to_vmem [thread:$0]  %s731_s0, 64, %s20_s8, [#allocation3], %s617_s1, %s617_s1, %s618_s17  }
  0x25   :  { %s619_s20 = smov [#allocation7]   ;;  %s539_s24 = scalar_lea.hbm %s733_s2, 256 }
  0x26   :  { %s43_s21 = sshll.u32 %s619_s20, 4  ;;  %p540_p2 = scmp.ne.s32.totalorder %s733_s2, %s539_s24  ;;  %s44_s21 = int_to_ptr.vmem [resolvable:$true] %s43_s21 }
  0x27   :  { %p543_p3 = scmp.lt.u32.totalorder %s539_s24, %s733_s2 }
  0x29   :  { %p545_p4 = pnand %p543_p3, %p540_p2 }
  0x2b   :  { %548 = shalt.err (!%p545_p4)
}
  0x2c   :  { %s549_s29 = scalar_lea.vmem %s44_s21, 256  ;;  %p554_p6 = scmp.lt.s32.totalorder %s44_s21, %s44_s21 }
  0x2d   :  { %p550_p5 = scmp.ne.s32.totalorder %s44_s21, %s549_s29  ;;  %p555_p7 = scmp.lt.s32.totalorder %s549_s29, %s549_s29 }
  0x2f   :  { %p556_p8 = por %p555_p7, %p554_p6 }
  0x31   :  { %p557_p9 = pnand %p556_p8, %p550_p5 }
  0x33   :  { %560 = shalt.err (!%p557_p9)
}
  0x34   :  { %s620_s0 = smov 128   ;;  %s621_s30 = smov 8  }
  0x35   :  { %49 = dma.hbm_to_vmem [thread:$0]  %s733_s2, 256, %s44_s21, [#allocation6], %s620_s0, %s620_s0, %s621_s30  }
  0x36   :  { %s622_s8 = smov [#allocation8]   ;;  %s561_s12 = scalar_lea.hbm %s734_s3, 2048 }
  0x37   :  { %s55_s9 = sshll.u32 %s622_s8, 4  ;;  %p562_p10 = scmp.ne.s32.totalorder %s734_s3, %s561_s12  ;;  %s56_s9 = int_to_ptr.vmem [resolvable:$true] %s55_s9 }
  0x38   :  { %p565_p11 = scmp.lt.u32.totalorder %s561_s12, %s734_s3 }
  0x3a   :  { %p567_p12 = pnand %p565_p11, %p562_p10 }
  0x3c   :  { %570 = shalt.err (!%p567_p12)
}
  0x3d   :  { %s571_s1 = scalar_lea.vmem %s56_s9, 2048  ;;  %p576_p0 = scmp.lt.s32.totalorder %s56_s9, %s56_s9 }
  0x3e   :  { %p572_p13 = scmp.ne.s32.totalorder %s56_s9, %s571_s1  ;;  %p577_p1 = scmp.lt.s32.totalorder %s571_s1, %s571_s1 }
  0x40   :  { %p578_p2 = por %p577_p1, %p576_p0 }
  0x42   :  { %p579_p3 = pnand %p578_p2, %p572_p13 }
  0x44   :  { %582 = shalt.err (!%p579_p3)
}
  0x45   :  { %61 = dma.hbm_to_vmem [thread:$0]  %s734_s3, 2048, %s56_s9, [#allocation9], %s620_s0, %s620_s0, %s621_s30  }
  0x46   :  { %605 = dma.done.wait [#allocation3], 64  }
  0x47   :  { %606 = vsyncadd [#allocation3], 4294967232 }
  0x48   :  { %607 = dma.done.wait [#allocation6], 384  }
  0x49   :  { %608 = vsyncadd [#allocation6], 4294966912 }
  0x4a   :  { %609 = dma.done.wait [#allocation9], 2048  }
  0x4b   :  { %610 = vsyncadd [#allocation9], 4294965248  ;;  %v78_v0 = vlaneseq  ;;  %v623_v1 = vmov 0.0   ;;  %vm624_vm0 = vmmov 0   ;;  %v370_v5 = vld [vmem:[#allocation2] sm:$0xf]  }
  0x4c   :  { %397 = vmatprep.subr.bf16.mxu1 %v623_v1  ;;  %399 = vmatprep.mubr.msk.bf16.mxu1 %vm624_vm0, %v623_v1  ;;  %v494_v6 = vld [vmem:[#allocation5] sm:$0xff]   ;;  %v371_v7 = vunpack.c.0.s8 %v370_v5  ;;  %v372_v8 = vunpack.c.1.s8 %v370_v5  ;;  %v160_v9 = vld [vmem:[#allocation7] sm:$0xff]  ;;  %v161_v10 = vld [vmem:[#allocation7 + $0x8] sm:$0xff]  ;;  %vm111_vm3 = vcmask 130048   ;;  %s625_s19 = smov [#allocation10]  }
  0x4d   :  { %v79_v2 = vshrl.u32 %v78_v0, 7  ;;  %v85_v3 = vand.u32 127, %v78_v0  ;;  %398 = vmatpush3.bf16.msra.mxu1 %v494_v6  ;;  %v445_v13 = vpack.c.bf16 %v161_v10, %v160_v9  ;;  %v243_v21 = vld [vmem:[#allocation8] sm:$0xff]  ;;  %v244_v22 = vld [vmem:[#allocation8 + $0x8] sm:$0xff]  ;;  %v245_v23 = vld [vmem:[#allocation8 + $0x10] sm:$0xff]  ;;  %s348_s20 = sshll.u32 %s625_s19, 4  ;;  %s349_s20 = int_to_ptr.vmem [resolvable:$true] %s348_s20 }
  0x4e   :  { %v96_v14 = vcvt.s32.f32 %v371_v7  ;;  %v97_v15 = vcvt.s32.f32 %v372_v8  ;;  %v449_v24 = vpack.c.bf16 %v244_v22, %v243_v21  ;;  %v246_v25 = vld [vmem:[#allocation8 + $0x18] sm:$0xff]  ;;  %v247_v27 = vld [vmem:[#allocation8 + $0x20] sm:$0xff]  ;;  %v248_v28 = vld [vmem:[#allocation8 + $0x28] sm:$0xff]  ;;  %s583_s21 = scalar_lea.vmem %s349_s20, 256  ;;  %p588_p5 = scmp.lt.s32.totalorder %s349_s20, %s349_s20 }
  0x4f   :  { %v80_v4 = vadd.s32 8, %v79_v2  ;;  %vm86_vm1 = vcmp.eq.s32.totalorder %v79_v2, %v85_v3  ;;  %446 = vmatprep.subr.bf16.mxu1 %v445_v13  ;;  %v453_v26 = vpack.c.bf16 %v246_v25, %v245_v23  ;;  %v457_v29 = vpack.c.bf16 %v248_v28, %v247_v27  ;;  %v249_v30 = vld [vmem:[#allocation8 + $0x30] sm:$0xff]  ;;  %v250_v31 = vld [vmem:[#allocation8 + $0x38] sm:$0xff]  ;;  %v251_v33 = vld [vmem:[#allocation8 + $0x40] sm:$0xff]  ;;  %p584_p4 = scmp.ne.s32.totalorder %s349_s20, %s583_s21  ;;  %p589_p6 = scmp.lt.s32.totalorder %s583_s21, %s583_s21 }
  0x50   :  { %v362_v11 = vsel %vm86_vm1, 1.0, %v623_v1  ;;  %450 = vmatprep.subr.bf16.mxu0 %v449_v24  ;;  %v461_v32 = vpack.c.bf16 %v250_v31, %v249_v30  ;;  %v252_v34 = vld [vmem:[#allocation8 + $0x48] sm:$0xff]  ;;  %v253_v36 = vld [vmem:[#allocation8 + $0x50] sm:$0xff]  ;;  %v254_v37 = vld [vmem:[#allocation8 + $0x58] sm:$0xff] }
  0x51   :  { %vm87_vm2 = vcmp.eq.s32.totalorder %v80_v4, %v85_v3  ;;  %v98_v16 = vadd.f32 %v362_v11, %v96_v14  ;;  %452 = vmatpush3.bf16.msra.mxu0 %v449_v24  ;;  %v465_v35 = vpack.c.bf16 %v252_v34, %v251_v33  ;;  %v469_v38 = vpack.c.bf16 %v254_v37, %v253_v36  ;;  %v255_v39 = vld [vmem:[#allocation8 + $0x60] sm:$0xff]  ;;  %v256_v40 = vld [vmem:[#allocation8 + $0x68] sm:$0xff]  ;;  %v257_v42 = vld [vmem:[#allocation8 + $0x70] sm:$0xff]  ;;  %p590_p7 = por %p589_p6, %p588_p5 }
  0x52   :  { %v363_v12 = vsel %vm87_vm2, 1.0, %v623_v1  ;;  %454 = vmatprep.subr.bf16.mxu0 %v453_v26  ;;  %v473_v41 = vpack.c.bf16 %v256_v40, %v255_v39  ;;  %v258_v43 = vld [vmem:[#allocation8 + $0x78] sm:$0xff]  ;;  %v368_v55 = vld [vmem:[%s735_s4] ss:$0 sm:$0xff] }
  0x53   :  { %v99_v17 = vadd.f32 %v363_v12, %v97_v15  ;;  %v100_v18 = vmin.f32 %v98_v16, 1.0  ;;  %v477_v44 = vpack.c.bf16 %v258_v43, %v257_v42  ;;  %p591_p8 = pnand %p590_p7, %p584_p4 }
  0x55   :  { %v101_v19 = vmin.f32 %v99_v17, 1.0  ;;  %456 = vmatpush3.bf16.msra.mxu0 %v453_v26 }
  0x56   :  { %458 = vmatprep.subr.bf16.mxu0 %v457_v29 }
  0x57   :  { %v104_v20 = vpack.c.bf16 %v101_v19, %v100_v18 }
  0x59   :  { %400 = vmatmul.mubr.msk.bf16.vlgmr.msra.gmra.mrb[0].mxu1 %vm111_vm3, %v104_v20  ;;  %460 = vmatpush3.bf16.msra.mxu0 %v457_v29 }
  0x5a   :  { %448 = vmatpush3.bf16.msra.mxu1 %v445_v13  ;;  %462 = vmatprep.subr.bf16.mxu0 %v461_v32 }
  0x5d   :  { %464 = vmatpush3.bf16.msra.mxu0 %v461_v32 }
  0x5e   :  { %466 = vmatprep.subr.bf16.mxu0 %v465_v35 }
  0x61   :  { %468 = vmatpush3.bf16.msra.mxu0 %v465_v35 }
  0x62   :  { %470 = vmatprep.subr.bf16.mxu0 %v469_v38 }
  0x65   :  { %472 = vmatpush3.bf16.msra.mxu0 %v469_v38 }
  0x66   :  { %474 = vmatprep.subr.bf16.mxu0 %v473_v41 }
  0x69   :  { %476 = vmatpush3.bf16.msra.mxu0 %v473_v41 }
  0x6a   :  { %478 = vmatprep.subr.bf16.mxu0 %v477_v44 }
  0x6d   :  { %480 = vmatpush3.bf16.msra.mxu0 %v477_v44 }
 0x12c   :  { %v149_v45 = vpop.f32.mrb[0].mxu1 }
 0x12d   :  { %v156_v46 = vadd.f32 %v149_v45, %v100_v18  ;;  %v401_v47 = vpop.f32.mrb[1].mxu1 }
 0x12e   :  { %v152_v48 = vpop.f32.mrb[2].mxu1 }
 0x12f   :  { %v158_v49 = vmin.f32 %v156_v46, 1.0  ;;  %v157_v50 = vadd.f32 %v152_v48, %v101_v19  ;;  %v402_v51 = vpop.f32.mrb[3].mxu1 }
 0x131   :  { %v159_v52 = vmin.f32 %v157_v50, 1.0  ;;  %407 = vmatprep.mubr.msk.f32.mxu1 %vm111_vm3, %v158_v49 }
 0x133   :  { %408 = vmatmul.mubr.msk.f32.vlgmr.msra.gmra.mrb[4].mxu1 %vm111_vm3, %v159_v52 }
 0x206   :  { %v409_v53 = vpop.f32.mrb[4].mxu1 }
 0x207   :  { %v234_v54 = vpop.f32.mrb[5].mxu1 }
 0x208   :  { %442 = vmatprep.mubr.f32.mxu0 %v234_v54 }
 0x209   :  { %443 = vmatmul.mubr.f32.vlgmr.msra.gmra.mrb[0].mxu0 %v409_v53 }
 0x2dc   :  { %v444_v56 = vpop.f32.mrb[0].mxu0 }
 0x2dd   :  { %v338_v57 = vadd.f32 %v444_v56, %v368_v55  ;;  %v332_v58 = vpop.f32.mrb[1].mxu0 }
 0x2de   :  { %v333_v59 = vadd.f32 %v368_v55, %v332_v58 }
 0x2df   :  { %342 = vst [vmem:[#allocation10 + $0x8] sm:$0xff] %v338_v57 }
 0x2e0   :  { %341 = vst [vmem:[#allocation10] sm:$0xff] %v333_v59 }
 0x2e1   :  { %594 = shalt.err (!%p591_p8)
}
 0x2e2   :  { %s595_s4 = scalar_lea.hbm %s736_s5, 256 }
 0x2e3   :  { %p596_p9 = scmp.ne.s32.totalorder %s736_s5, %s595_s4  ;;  %p599_p10 = scmp.lt.u32.totalorder %s595_s4, %s736_s5 }
 0x2e5   :  { %p601_p11 = pnand %p599_p10, %p596_p9 }
 0x2e7   :  { %604 = shalt.err (!%p601_p11)
}
 0x2e8   :  { %354 = dma.vmem_to_hbm [thread:$0]  %s349_s20, 256, %s736_s5, [#allocation4], %s620_s0, %s620_s0, %s621_s30  }
 0x2e9   :  { %611 = dma.done.wait [#allocation4], 256  }
 0x2ea   :  { %612 = vsyncadd [#allocation4], 4294967040 }
 0x2eb   :  { %358 = vsyncpa [#allocation3], 1 }
 0x2ec   :  { %359 = vsyncpa [#allocation6], 1 }
 0x2ed   :  { %360 = vsyncpa [#allocation9], 1 }
 0x2ee   :  { %361 = vsyncpa [#allocation4], 1 }

</bundles_post_ra>
